<compile_context>
chip_gen: v7x
topology: tpu7x:2x2x1
jax: 0.10.0
libtpu: 0.0.40
codegen_flags: <defaults>
</compile_context>

<pallas_src>
import functools

import jax
import jax.numpy as jnp
from jax.experimental import pallas as pl
from jax.experimental.pallas import tpu as pltpu


def _round_up(x, m):
    return ((x + m - 1) // m) * m


# --------------------------------------------------------------------------- #
# Kernel
# --------------------------------------------------------------------------- #
def _tgaa_mlp_kernel(x_ref, w1_ref, b1_ref, w2_ref, b2_ref, o_ref, *, row_counts):
    # Masked-sum readout.  The mask is already folded into x at pack time, so the
    # pooled vector for dim i is just the sum over its (static) row range.  Each
    # row holds `groups` cells side by side in lanes; the resulting per-lane-group
    # partial sums are absorbed by the replicated rows of w1p.
    parts = []
    off = 0
    for r in row_counts:                                  # static Python loop
        xi = x_ref[:, off:off + r, :].astype(jnp.float32)  # bf16 -> f32 upcast
        parts.append(jnp.sum(xi, axis=1))                  # (Bt, K_lane), f32 acc
        off += r
    pooled = jnp.concatenate(parts, axis=-1)               # (Bt, n_dims*K_lane)

    # Fused block-diagonal lin1 (all cochain dims in one matmul) + relu.
    h = jnp.maximum(
        jnp.dot(pooled, w1_ref[...], preferred_element_type=jnp.float32)
        + b1_ref[...],
        0.0,
    )                                                      # (Bt, H_pad)

    # Lane-dense padded lin2; wrapper slices off the padding columns.
    o_ref[...] = (
        jnp.dot(h, w2_ref[...], preferred_element_type=jnp.float32) + b2_ref[...]
    ).astype(o_ref.dtype)                                  # (Bt, OUT_pad)


# --------------------------------------------------------------------------- #
# One-time weight packing (hoisted out of the per-call path)
# --------------------------------------------------------------------------- #
def pack_tgaa_weights(w1s, b1s, w2, b2, *, D, groups, K_lane):
    n_dims = len(w1s)
    H = w1s[0].shape[1]
    OUT = w2.shape[1]
    H_pad = _round_up(n_dims * H, 128)
    OUT_pad = _round_up(OUT, 128)
    K_total = n_dims * K_lane

    w1p = jnp.zeros((K_total, H_pad), jnp.float32)
    b1p = jnp.zeros((1, H_pad), jnp.float32)
    for i in range(n_dims):
        # Replicate W1_i over the `groups` lane groups: sum_g(partial_g @ W1_i)
        # == (full pooled sum) @ W1_i.
        blk = jnp.concatenate([jnp.asarray(w1s[i], jnp.float32)] * groups, axis=0)
        w1p = w1p.at[i * K_lane:i * K_lane + groups * D,
                     i * H:(i + 1) * H].set(blk)
        b1p = b1p.at[:, i * H:(i + 1) * H].set(
            jnp.asarray(b1s[i], jnp.float32).reshape(1, H))

    w2p = (jnp.zeros((H_pad, OUT_pad), jnp.float32)
           .at[:n_dims * H, :OUT].set(jnp.asarray(w2, jnp.float32)))
    b2p = (jnp.zeros((1, OUT_pad), jnp.float32)
           .at[:, :OUT].set(jnp.asarray(b2, jnp.float32).reshape(1, OUT)))
    return w1p, b1p, w2p, b2p


# --------------------------------------------------------------------------- #
# Per-call feature packing (mask folded in, 4 cells / row, bf16 storage)
# --------------------------------------------------------------------------- #
def pack_tgaa_features(masks, xs, *, D, groups, K_lane, row_counts, B_pad, x_dtype):
    B = xs[0].shape[0]
    R_total = sum(row_counts)
    x_all = jnp.zeros((B_pad, R_total, K_lane), x_dtype)
    off = 0
    for i in range(len(xs)):
        n_i = xs[i].shape[1]
        r = row_counts[i]
        # Fold the mask into the features once, here.
        xm = masks[i][:, :, None].astype(jnp.float32) * xs[i].astype(jnp.float32)
        xm = jnp.pad(xm, ((0, 0), (0, r * groups - n_i), (0, 0)))     # pad cells
        xm = xm.reshape(B, r, groups * D)                             # 4 cells/row
        xm = jnp.pad(xm, ((0, B_pad - B), (0, 0), (0, K_lane - groups * D)))
        x_all = x_all.at[:, off:off + r, :].set(xm.astype(x_dtype))
        off += r
    return x_all


# --------------------------------------------------------------------------- #
# Forward
# --------------------------------------------------------------------------- #
def tgaa_mlp_forward(masks, xs, packed_weights, out_size, *,
                     x_dtype=jnp.bfloat16, batch_tile=128):
    w1p, b1p, w2p, b2p = packed_weights
    n_dims = len(xs)
    B, _, D = xs[0].shape

    groups = 128 // D if (D <= 128 and 128 % D == 0) else 1
    K_lane = _round_up(groups * D, 128)
    row_counts = tuple(_round_up(pl.cdiv(x.shape[1], groups), 8) for x in xs)
    R_total = sum(row_counts)

    K_total, H_pad = w1p.shape
    OUT_pad = w2p.shape[1]
    assert K_total == n_dims * K_lane

    # Batch tiling: full sublanes at minimum, up to `batch_tile` rows per step.
    B_tile = min(_round_up(B, 8), _round_up(batch_tile, 8))
    B_pad = _round_up(B, B_tile)
    grid = (B_pad // B_tile,)

    x_all = pack_tgaa_features(masks, xs, D=D, groups=groups, K_lane=K_lane,
                               row_counts=row_counts, B_pad=B_pad, x_dtype=x_dtype)

    # VMEM budget: double-buffered x + out blocks, resident (but also
    # double-buffered) weights, plus headroom.  Clamp to v7x's 64 MiB physical.
    x_block = B_tile * R_total * K_lane * jnp.dtype(x_dtype).itemsize
    o_block = B_tile * OUT_pad * 4
    w_bytes = (w1p.size + b1p.size + w2p.size + b2p.size) * 4
    est = 2 * x_block + 2 * o_block + 2 * w_bytes
    vmem_limit = int(min(64 << 20, max(16 << 20, 2 * est)))

    kernel = functools.partial(_tgaa_mlp_kernel, row_counts=row_counts)

    out_full = pl.pallas_call(
        kernel,
        out_shape=jax.ShapeDtypeStruct((B_pad, OUT_pad), jnp.float32),
        grid_spec=pltpu.PrefetchScalarGridSpec(
            num_scalar_prefetch=0,
            grid=grid,
            in_specs=[
                # Streaming batch-tiled features.
                pl.BlockSpec((B_tile, R_total, K_lane), lambda b: (b, 0, 0)),
                # Constant-index weight blocks: DMA'd once, VMEM-resident.
                pl.BlockSpec((K_total, H_pad), lambda b: (0, 0)),
                pl.BlockSpec((1, H_pad), lambda b: (0, 0)),
                pl.BlockSpec((H_pad, OUT_pad), lambda b: (0, 0)),
                pl.BlockSpec((1, OUT_pad), lambda b: (0, 0)),
            ],
            out_specs=pl.BlockSpec((B_tile, OUT_pad), lambda b: (b, 0)),
        ),
        compiler_params=pltpu.CompilerParams(
            dimension_semantics=("parallel",),
            vmem_limit_bytes=vmem_limit,
        ),
    )(x_all, w1p, b1p, w2p, b2p)

    return out_full[:B, :out_size]


# --------------------------------------------------------------------------- #
# Pure-JAX reference (same bf16 storage of masked features as the kernel)
# --------------------------------------------------------------------------- #
def tgaa_mlp_reference(masks, xs, w1s, b1s, w2, b2, x_dtype=jnp.bfloat16):
    hs = []
    for m, x, w1, b1 in zip(masks, xs, w1s, b1s):
        xm = (m[:, :, None] * x).astype(x_dtype).astype(jnp.float32)
        pooled = jnp.sum(xm, axis=1)
        hs.append(jnp.maximum(pooled @ w1 + b1, 0.0))
    return jnp.concatenate(hs, axis=-1) @ w2 + b2


if __name__ == "__main__":
    # Small shapes consistent with the module:
    #   batch=2, embed_dim=32, max_dim=2 (3 cochain dims), final_hidden_multiplier=2,
    #   out_size=10, per-dim max cell counts (16, 24, 8).
    B = 2
    D = 32            # embed_dim
    FH = 2            # final_hidden_multiplier
    H = FH * D        # hidden per dim
    OUT = 10          # out_size
    MAX_DIM = 2
    N = (16, 24, 8)   # max_num of nodes / edges / 2-cells

    key = jax.random.PRNGKey(0)
    keys = jax.random.split(key, 4 * (MAX_DIM + 1) + 2)

    masks, xs, w1s, b1s = [], [], [], []
    k = 0
    for i in range(MAX_DIM + 1):
        masks.append((jax.random.uniform(keys[k], (B, N[i])) > 0.3)
                     .astype(jnp.float32)); k += 1
        xs.append(jax.random.normal(keys[k], (B, N[i], D), jnp.float32)); k += 1
        # PyTorch Linear-like deterministic init: uniform(+-1/sqrt(fan_in))
        bound1 = 1.0 / (D ** 0.5)
        w1s.append(jax.random.uniform(keys[k], (D, H), jnp.float32,
                                      -bound1, bound1)); k += 1
        b1s.append(jax.random.uniform(keys[k], (1, H), jnp.float32,
                                      -bound1, bound1)); k += 1
    bound2 = 1.0 / ((H * (MAX_DIM + 1)) ** 0.5)
    w2 = jax.random.uniform(keys[k], (H * (MAX_DIM + 1), OUT), jnp.float32,
                            -bound2, bound2); k += 1
    b2 = jax.random.uniform(keys[k], (1, OUT), jnp.float32, -bound2, bound2)

    # Weight packing is done ONCE (hoisted out of the per-call path).
    groups = 128 // D
    K_lane = groups * D
    packed_weights = pack_tgaa_weights(w1s, b1s, w2, b2,
                                       D=D, groups=groups, K_lane=K_lane)
    packed_weights = jax.block_until_ready(packed_weights)

    out = tgaa_mlp_forward(masks, xs, packed_weights, OUT)
    out = jax.block_until_ready(out)

    ref = tgaa_mlp_reference(masks, xs, w1s, b1s, w2, b2)
    assert out.shape == (B, OUT)
    assert jnp.allclose(out, ref, atol=2e-3, rtol=2e-3), (
        float(jnp.max(jnp.abs(out - ref))))

    print("KERNEL_OK")
</pallas_src>

<mosaic_0001>
module attributes {stable_mosaic.version = 11 : i64} {
  func.func @_tgaa_mlp_kernel(%arg0: i32, %arg1: memref<8x24x128xbf16, #tpu.memory_space<vmem>>, %arg2: memref<384x256xf32, #tpu.memory_space<vmem>>, %arg3: memref<1x256xf32, #tpu.memory_space<vmem>>, %arg4: memref<256x128xf32, #tpu.memory_space<vmem>>, %arg5: memref<1x128xf32, #tpu.memory_space<vmem>>, %arg6: memref<8x128xf32, #tpu.memory_space<vmem>>) attributes {dimension_semantics = [#tpu.dimension_semantics<parallel>], iteration_bounds = array<i64: 1>, scalar_prefetch = 0 : i64, scratch_operands = 0 : i64, tpu.core_type = #tpu.core_type<tc>, window_params = [{transform_indices = @transform_0, window_bounds = array<i64: 8, 24, 128>}, {pipeline_mode = #tpu.pipeline_mode<synchronous>, transform_indices = @transform_1, window_bounds = array<i64: 384, 256>}, {pipeline_mode = #tpu.pipeline_mode<synchronous>, transform_indices = @transform_2, window_bounds = array<i64: 1, 256>}, {pipeline_mode = #tpu.pipeline_mode<synchronous>, transform_indices = @transform_3, window_bounds = array<i64: 256, 128>}, {pipeline_mode = #tpu.pipeline_mode<synchronous>, transform_indices = @transform_4, window_bounds = array<i64: 1, 128>}, {transform_indices = @transform_5, window_bounds = array<i64: 8, 128>}]} {
    %c0 = arith.constant 0 : index
    %c0_0 = arith.constant 0 : index
    %c0_1 = arith.constant 0 : index
    %0 = vector.load %arg1[%c0, %c0_0, %c0_1] : memref<8x24x128xbf16, #tpu.memory_space<vmem>>, vector<8x8x128xbf16>
    %1 = arith.extf %0 : vector<8x8x128xbf16> to vector<8x8x128xf32>
    %cst = arith.constant dense<0.000000e+00> : vector<8x128xf32>
    %2 = vector.multi_reduction <add>, %1, %cst [1] : vector<8x8x128xf32> to vector<8x128xf32>
    %c0_2 = arith.constant 0 : index
    %c8 = arith.constant 8 : index
    %c0_3 = arith.constant 0 : index
    %3 = vector.load %arg1[%c0_2, %c8, %c0_3] : memref<8x24x128xbf16, #tpu.memory_space<vmem>>, vector<8x8x128xbf16>
    %4 = arith.extf %3 : vector<8x8x128xbf16> to vector<8x8x128xf32>
    %cst_4 = arith.constant dense<0.000000e+00> : vector<8x128xf32>
    %5 = vector.multi_reduction <add>, %4, %cst_4 [1] : vector<8x8x128xf32> to vector<8x128xf32>
    %c0_5 = arith.constant 0 : index
    %c16 = arith.constant 16 : index
    %c0_6 = arith.constant 0 : index
    %6 = vector.load %arg1[%c0_5, %c16, %c0_6] : memref<8x24x128xbf16, #tpu.memory_space<vmem>>, vector<8x8x128xbf16>
    %7 = arith.extf %6 : vector<8x8x128xbf16> to vector<8x8x128xf32>
    %cst_7 = arith.constant dense<0.000000e+00> : vector<8x128xf32>
    %8 = vector.multi_reduction <add>, %7, %cst_7 [1] : vector<8x8x128xf32> to vector<8x128xf32>
    %9 = tpu.concatenate %2, %5, %8 in 1 : vector<8x128xf32>, vector<8x128xf32>, vector<8x128xf32> -> vector<8x384xf32>
    %c0_8 = arith.constant 0 : index
    %c0_9 = arith.constant 0 : index
    %10 = vector.load %arg2[%c0_8, %c0_9] : memref<384x256xf32, #tpu.memory_space<vmem>>, vector<384x256xf32>
    %cst_10 = arith.constant dense<0.000000e+00> : vector<8x256xf32>
    %11 = tpu.matmul %9, %10, %cst_10 {dimension_numbers = #tpu.dot_dimension_numbers<[1], [0], [0], [1], [0, 0, 1, 1], [], []>} : vector<8x384xf32>, vector<384x256xf32>, vector<8x256xf32> -> vector<8x256xf32>
    %c0_11 = arith.constant 0 : index
    %c0_12 = arith.constant 0 : index
    %12 = vector.load %arg3[%c0_11, %c0_12] : memref<1x256xf32, #tpu.memory_space<vmem>>, vector<1x256xf32>
    %13 = vector.broadcast %12 : vector<1x256xf32> to vector<8x256xf32>
    %14 = arith.addf %11, %13 : vector<8x256xf32>
    %cst_13 = arith.constant 0.000000e+00 : f32
    %15 = vector.broadcast %cst_13 : f32 to vector<8x256xf32>
    %16 = arith.maximumf %14, %15 : vector<8x256xf32>
    %c0_14 = arith.constant 0 : index
    %c0_15 = arith.constant 0 : index
    %17 = vector.load %arg4[%c0_14, %c0_15] : memref<256x128xf32, #tpu.memory_space<vmem>>, vector<256x128xf32>
    %cst_16 = arith.constant dense<0.000000e+00> : vector<8x128xf32>
    %18 = tpu.matmul %16, %17, %cst_16 {dimension_numbers = #tpu.dot_dimension_numbers<[1], [0], [0], [1], [0, 0, 1, 1], [], []>} : vector<8x256xf32>, vector<256x128xf32>, vector<8x128xf32> -> vector<8x128xf32>
    %c0_17 = arith.constant 0 : index
    %c0_18 = arith.constant 0 : index
    %19 = vector.load %arg5[%c0_17, %c0_18] : memref<1x128xf32, #tpu.memory_space<vmem>>, vector<1x128xf32>
    %20 = vector.broadcast %19 : vector<1x128xf32> to vector<8x128xf32>
    %21 = arith.addf %18, %20 : vector<8x128xf32>
    %c0_19 = arith.constant 0 : index
    %c0_20 = arith.constant 0 : index
    %22 = vector.load %arg6[%c0_19, %c0_20] : memref<8x128xf32, #tpu.memory_space<vmem>>, vector<8x128xf32>
    tpu.vector_store %arg6[%c0_19, %c0_20], %21 {strides = array<i32>} : memref<8x128xf32, #tpu.memory_space<vmem>>, vector<8x128xf32>,
    return
  }
  func.func @transform_0(%arg0: i32) -> (i32, i32, i32) {
    %c0_i32 = arith.constant 0 : i32
    %c0_i32_0 = arith.constant 0 : i32
    %c0_i32_1 = arith.constant 0 : i32
    return %arg0, %c0_i32, %c0_i32_0 : i32, i32, i32
  }
  func.func @transform_1(%arg0: i32) -> (i32, i32) {
    %c0_i32 = arith.constant 0 : i32
    %c0_i32_0 = arith.constant 0 : i32
    %c0_i32_1 = arith.constant 0 : i32
    return %c0_i32, %c0_i32_0 : i32, i32
  }
  func.func @transform_2(%arg0: i32) -> (i32, i32) {
    %c0_i32 = arith.constant 0 : i32
    %c0_i32_0 = arith.constant 0 : i32
    %c0_i32_1 = arith.constant 0 : i32
    return %c0_i32, %c0_i32_0 : i32, i32
  }
  func.func @transform_3(%arg0: i32) -> (i32, i32) {
    %c0_i32 = arith.constant 0 : i32
    %c0_i32_0 = arith.constant 0 : i32
    %c0_i32_1 = arith.constant 0 : i32
    return %c0_i32, %c0_i32_0 : i32, i32
  }
  func.func @transform_4(%arg0: i32) -> (i32, i32) {
    %c0_i32 = arith.constant 0 : i32
    %c0_i32_0 = arith.constant 0 : i32
    %c0_i32_1 = arith.constant 0 : i32
    return %c0_i32, %c0_i32_0 : i32, i32
  }
  func.func @transform_5(%arg0: i32) -> (i32, i32) {
    %c0_i32 = arith.constant 0 : i32
    %c0_i32_0 = arith.constant 0 : i32
    return %arg0, %c0_i32 : i32, i32
  }
}

</mosaic_0001>

<bundles_post_ra>
// kernel: tpu_custom_call.1
= control target key start
LH: loop header
LB: loop body
LE: loop exit
PB: predicated region body
PF: predicated region fallthrough
CT: control target
= control target key end

     0   :  { %10 = vsyncpa [#allocation3], 0  ;;  %s1299_s0 = inlined_call_operand.hbm [shape: bf16[8,24,128], index: 0, kind: input, shape index: {}]   ;;  %s1300_s1 = inlined_call_operand.hbm [shape: f32[384,256], index: 1, kind: input, shape index: {}]   ;;  %s1301_s2 = inlined_call_operand.vmem [shape: f32[1,256], index: 2, kind: input, shape index: {}]   ;;  %s1302_s3 = inlined_call_operand.hbm [shape: f32[256,128], index: 3, kind: input, shape index: {}]   ;;  %s1303_s4 = inlined_call_operand.vmem [shape: f32[1,128], index: 4, kind: input, shape index: {}]   ;;  %s1304_s5 = inlined_call_operand.hbm [shape: f32[8,128], index: 5, kind: output, shape index: {}]  }
   0x1   :  { %11 = vsyncpa [#allocation6], 0 }
   0x2   :  { %12 = vsyncpa [#allocation4], 0  ;;  %s960_s18 = smov [#allocation5]   ;;  %s866_s22 = scalar_lea.hbm %s1300_s1, 12288 }
   0x3   :  { %s30_s19 = sshll.u32 %s960_s18, 4  ;;  %p867_p0 = scmp.ne.s32.totalorder %s1300_s1, %s866_s22  ;;  %s31_s19 = int_to_ptr.vmem [resolvable:$true] %s30_s19 }
   0x4   :  { %p870_p1 = scmp.lt.u32.totalorder %s866_s22, %s1300_s1 }
   0x6   :  { %p872_p2 = pnand %p870_p1, %p867_p0 }
   0x8   :  { %875 = shalt.err (!%p872_p2)
}
   0x9   :  { %s876_s27 = scalar_lea.vmem %s31_s19, 12288  ;;  %p881_p4 = scmp.lt.s32.totalorder %s31_s19, %s31_s19 }
   0xa   :  { %p877_p3 = scmp.ne.s32.totalorder %s31_s19, %s876_s27  ;;  %p882_p5 = scmp.lt.s32.totalorder %s876_s27, %s876_s27 }
   0xc   :  { %p883_p6 = por %p882_p5, %p881_p4 }
   0xe   :  { %p884_p7 = pnand %p883_p6, %p877_p3 }
  0x10   :  { %887 = shalt.err (!%p884_p7)
}
  0x11   :  { %s961_s28 = smov 256   ;;  %s962_s29 = smov 16  }
  0x12   :  { %36 = dma.hbm_to_vmem [thread:$0]  %s1300_s1, 12288, %s31_s19, [#allocation6], %s961_s28, %s961_s28, %s962_s29  }
  0x13   :  { %s963_s7 = smov [#allocation2]   ;;  %s888_s11 = scalar_lea.hbm %s1299_s0, 1536 }
  0x14   :  { %s18_s8 = sshll.u32 %s963_s7, 4  ;;  %p889_p8 = scmp.ne.s32.totalorder %s1299_s0, %s888_s11  ;;  %s19_s8 = int_to_ptr.vmem [resolvable:$true] %s18_s8 }
  0x15   :  { %p892_p9 = scmp.lt.u32.totalorder %s888_s11, %s1299_s0 }
  0x17   :  { %p894_p10 = pnand %p892_p9, %p889_p8 }
  0x19   :  { %897 = shalt.err (!%p894_p10)
}
  0x1a   :  { %s898_s16 = scalar_lea.vmem %s19_s8, 1536  ;;  %p903_p12 = scmp.lt.s32.totalorder %s19_s8, %s19_s8 }
  0x1b   :  { %p899_p11 = scmp.ne.s32.totalorder %s19_s8, %s898_s16  ;;  %p904_p13 = scmp.lt.s32.totalorder %s898_s16, %s898_s16 }
  0x1d   :  { %p905_p0 = por %p904_p13, %p903_p12 }
  0x1f   :  { %p906_p1 = pnand %p905_p0, %p899_p11 }
  0x21   :  { %909 = shalt.err (!%p906_p1)
}
  0x22   :  { %s964_s1 = smov 64   ;;  %s965_s17 = smov 4  }
  0x23   :  { %24 = dma.hbm_to_vmem [thread:$0]  %s1299_s0, 1536, %s19_s8, [#allocation3], %s964_s1, %s964_s1, %s965_s17  }
  0x24   :  { %s966_s20 = smov [#allocation7]   ;;  %s910_s24 = scalar_lea.hbm %s1302_s3, 4096 }
  0x25   :  { %s44_s21 = sshll.u32 %s966_s20, 4  ;;  %p911_p2 = scmp.ne.s32.totalorder %s1302_s3, %s910_s24  ;;  %s45_s21 = int_to_ptr.vmem [resolvable:$true] %s44_s21 }
  0x26   :  { %p914_p3 = scmp.lt.u32.totalorder %s910_s24, %s1302_s3 }
  0x28   :  { %p916_p4 = pnand %p914_p3, %p911_p2 }
  0x2a   :  { %919 = shalt.err (!%p916_p4)
}
  0x2b   :  { %s920_s29 = scalar_lea.vmem %s45_s21, 4096  ;;  %p925_p6 = scmp.lt.s32.totalorder %s45_s21, %s45_s21 }
  0x2c   :  { %p921_p5 = scmp.ne.s32.totalorder %s45_s21, %s920_s29  ;;  %p926_p7 = scmp.lt.s32.totalorder %s920_s29, %s920_s29 }
  0x2e   :  { %p927_p8 = por %p926_p7, %p925_p6 }
  0x30   :  { %p928_p9 = pnand %p927_p8, %p921_p5 }
  0x32   :  { %931 = shalt.err (!%p928_p9)
}
  0x33   :  { %s967_s0 = smov 128   ;;  %s968_s30 = smov 8  }
  0x34   :  { %50 = dma.hbm_to_vmem [thread:$0]  %s1302_s3, 4096, %s45_s21, [#allocation6], %s967_s0, %s967_s0, %s968_s30  }
  0x35   :  { %954 = dma.done.wait [#allocation3], 1536  }
  0x36   :  { %955 = vsyncadd [#allocation3], 4294965760 }
  0x37   :  { %956 = dma.done.wait [#allocation6], 16384  }
  0x38   :  { %957 = vsyncadd [#allocation6], 4294950912  ;;  %v969_v0 = vmov 0.0   ;;  %v310_v1 = vld [vmem:[#allocation5 + $0x8] sm:$0xff]  ;;  %v312_v2 = vld [vmem:[#allocation5 + $0x18] sm:$0xff]  ;;  %vm262_vm0 = vcmask 1041409  }
  0x39   :  { %552 = vmatprep.mubr.f32.mxu1 %v969_v0  ;;  %v309_v3 = vld [vmem:[#allocation5] sm:$0xff]  ;;  %v723_v4 = vpack.c.bf16 %v312_v2, %v310_v1  ;;  %v311_v5 = vld [vmem:[#allocation5 + $0x10] sm:$0xff]  ;;  %v314_v6 = vld [vmem:[#allocation5 + $0x28] sm:$0xff]  ;;  %vm264_vm1 = vcmask 1042434   ;;  %vm266_vm2 = vcmask 1043459   ;;  %vm268_vm3 = vcmask 1044484  }
  0x3a   :  { %v316_v7 = vld [vmem:[#allocation5 + $0x38] sm:$0xff]  ;;  %v725_v8 = vpack.c.bf16 %v311_v5, %v309_v3  ;;  %v313_v10 = vld [vmem:[#allocation5 + $0x20] sm:$0xff]  ;;  %v315_v11 = vld [vmem:[#allocation5 + $0x30] sm:$0xff]  ;;  %vm270_vm4 = vcmask 1045509   ;;  %vm272_vm5 = vcmask 1046534   ;;  %vm274_vm6 = vcmask 1047559  }
  0x3b   :  { %v727_v9 = vpack.c.bf16 %v316_v7, %v314_v6  ;;  %v318_v12 = vld [vmem:[#allocation5 + $0x48] sm:$0xff]  ;;  %724 = vmatprep.subr.bf16.mxu0 %v723_v4  ;;  %v320_v13 = vld [vmem:[#allocation5 + $0x58] sm:$0xff]  ;;  %v729_v14 = vpack.c.bf16 %v315_v11, %v313_v10  ;;  %v317_v16 = vld [vmem:[#allocation5 + $0x40] sm:$0xff] }
  0x3c   :  { %726 = vmatpush1.bf16.msra.mxu0 %v725_v8  ;;  %v731_v15 = vpack.c.bf16 %v320_v13, %v318_v12  ;;  %v319_v17 = vld [vmem:[#allocation5 + $0x50] sm:$0xff]  ;;  %v322_v18 = vld [vmem:[#allocation5 + $0x68] sm:$0xff]  ;;  %v324_v19 = vld [vmem:[#allocation5 + $0x78] sm:$0xff] }
  0x3d   :  { %728 = vmatprep.subr.bf16.mxu0 %v727_v9  ;;  %v733_v20 = vpack.c.bf16 %v319_v17, %v317_v16  ;;  %v735_v21 = vpack.c.bf16 %v324_v19, %v322_v18  ;;  %v321_v22 = vld [vmem:[#allocation5 + $0x60] sm:$0xff]  ;;  %v323_v23 = vld [vmem:[#allocation5 + $0x70] sm:$0xff]  ;;  %v326_v24 = vld [vmem:[#allocation5 + $0x88] sm:$0xff] }
  0x3e   :  { %v328_v25 = vld [vmem:[#allocation5 + $0x98] sm:$0xff]  ;;  %v737_v26 = vpack.c.bf16 %v323_v23, %v321_v22  ;;  %v374_v27 = vld [vmem:[#allocation5 + $0x208] sm:$0xff]  ;;  %v373_v29 = vld [vmem:[#allocation5 + $0x200] sm:$0xff] }
  0x3f   :  { %v376_v28 = vld [vmem:[#allocation5 + $0x218] sm:$0xff]  ;;  %v739_v30 = vpack.c.bf16 %v328_v25, %v326_v24  ;;  %v325_v31 = vld [vmem:[#allocation5 + $0x80] sm:$0xff]  ;;  %v327_v32 = vld [vmem:[#allocation5 + $0x90] sm:$0xff] }
  0x40   :  { %730 = vmatpush1.bf16.msra.mxu0 %v729_v14  ;;  %v787_v33 = vpack.c.bf16 %v376_v28, %v374_v27  ;;  %v375_v34 = vld [vmem:[#allocation5 + $0x210] sm:$0xff]  ;;  %v330_v35 = vld [vmem:[#allocation5 + $0xa8] sm:$0xff]  ;;  %v332_v36 = vld [vmem:[#allocation5 + $0xb8] sm:$0xff]  ;;  %v741_v42 = vpack.c.bf16 %v327_v32, %v325_v31 }
  0x41   :  { %732 = vmatprep.subr.bf16.mxu0 %v731_v15  ;;  %v789_v37 = vpack.c.bf16 %v375_v34, %v373_v29  ;;  %v378_v38 = vld [vmem:[#allocation5 + $0x228] sm:$0xff]  ;;  %v380_v39 = vld [vmem:[#allocation5 + $0x238] sm:$0xff]  ;;  %v377_v40 = vld [vmem:[#allocation5 + $0x220] sm:$0xff]  ;;  %v743_v47 = vpack.c.bf16 %v332_v36, %v330_v35 }
  0x42   :  { %788 = vmatprep.subr.bf16.mxu1 %v787_v33  ;;  %v379_v41 = vld [vmem:[#allocation5 + $0x230] sm:$0xff]  ;;  %v329_v43 = vld [vmem:[#allocation5 + $0xa0] sm:$0xff]  ;;  %v791_v45 = vpack.c.bf16 %v380_v39, %v378_v38  ;;  %v334_v48 = vld [vmem:[#allocation5 + $0xc8] sm:$0xff] }
  0x43   :  { %v331_v44 = vld [vmem:[#allocation5 + $0xb0] sm:$0xff]  ;;  %790 = vmatpush1.bf16.msra.mxu1 %v789_v37  ;;  %v793_v46 = vpack.c.bf16 %v379_v41, %v377_v40  ;;  %v382_v49 = vld [vmem:[#allocation5 + $0x248] sm:$0xff]  ;;  %v384_v50 = vld [vmem:[#allocation5 + $0x258] sm:$0xff] }
  0x44   :  { %734 = vmatpush1.bf16.msra.mxu0 %v733_v20  ;;  %v336_v51 = vld [vmem:[#allocation5 + $0xd8] sm:$0xff]  ;;  %792 = vmatprep.subr.bf16.mxu1 %v791_v45  ;;  %v795_v52 = vpack.c.bf16 %v384_v50, %v382_v49  ;;  %v381_v53 = vld [vmem:[#allocation5 + $0x240] sm:$0xff]  ;;  %v383_v54 = vld [vmem:[#allocation5 + $0x250] sm:$0xff]  ;;  %v745_v57 = vpack.c.bf16 %v331_v44, %v329_v43 }
  0x45   :  { %736 = vmatprep.subr.bf16.mxu0 %v735_v21  ;;  %v1037_v55 = vld [vmem:[#allocation5 + $0xc0] sm:$0xff]  ;;  %v1039_v56 = vld [vmem:[#allocation5 + $0xd0] sm:$0xff]  ;;  %v1041_v58 = vld [vmem:[#allocation5 + $0xe8] sm:$0xff]  ;;  %v797_v60 = vpack.c.bf16 %v383_v54, %v381_v53  ;;  %v747_v63 = vpack.c.bf16 %v336_v51, %v334_v48 }
  0x46   :  { %v1043_v59 = vld [vmem:[#allocation5 + $0xf8] sm:$0xff]  ;;  %v386_v61 = vld [vmem:[#allocation5 + $0x268] sm:$0xff]  ;;  %v1045_v0 = vld [vmem:[#allocation5 + $0xe0] sm:$0xff]  ;;  %v749_v23 = vpack.c.bf16 %v1039_v56, %v1037_v55 }
  0x47   :  { %794 = vmatpush1.bf16.msra.mxu1 %v793_v46  ;;  %v388_v62 = vld [vmem:[#allocation5 + $0x278] sm:$0xff]  ;;  %v1047_v1 = vld [vmem:[#allocation5 + $0xf0] sm:$0xff]  ;;  %v1049_v2 = vld [vmem:[#allocation5 + $0x108] sm:$0xff]  ;;  %v751_v31 = vpack.c.bf16 %v1043_v59, %v1041_v58 }
  0x48   :  { %738 = vmatpush1.bf16.msra.mxu0 %v737_v26  ;;  %v1051_v3 = vld [vmem:[#allocation5 + $0x118] sm:$0xff]  ;;  %v1053_v4 = vld [vmem:[#allocation5 + $0x100] sm:$0xff]  ;;  %v1055_v5 = vld [vmem:[#allocation5 + $0x110] sm:$0xff]  ;;  %796 = vmatprep.subr.bf16.mxu1 %v795_v52  ;;  %v799_v6 = vpack.c.bf16 %v388_v62, %v386_v61  ;;  %v753_v39 = vpack.c.bf16 %v1047_v1, %v1045_v0 }
  0x49   :  { %740 = vmatprep.subr.bf16.mxu0 %v739_v30  ;;  %v385_v7 = vld [vmem:[#allocation5 + $0x260] sm:$0xff]  ;;  %v387_v8 = vld [vmem:[#allocation5 + $0x270] sm:$0xff]  ;;  %v1057_v9 = vld [vmem:[#allocation5 + $0x128] sm:$0xff]  ;;  %v755_v40 = vpack.c.bf16 %v1051_v3, %v1049_v2  ;;  %v757_v41 = vpack.c.bf16 %v1055_v5, %v1053_v4 }
  0x4a   :  { %v1059_v10 = vld [vmem:[#allocation5 + $0x138] sm:$0xff]  ;;  %v1061_v11 = vld [vmem:[#allocation5 + $0x120] sm:$0xff]  ;;  %v1063_v12 = vld [vmem:[#allocation5 + $0x130] sm:$0xff]  ;;  %v801_v24 = vpack.c.bf16 %v387_v8, %v385_v7 }
  0x4b   :  { %v1065_v13 = vld [vmem:[#allocation5 + $0x148] sm:$0xff]  ;;  %v1067_v14 = vld [vmem:[#allocation5 + $0x158] sm:$0xff]  ;;  %v1069_v15 = vld [vmem:[#allocation5 + $0x140] sm:$0xff]  ;;  %798 = vmatpush1.bf16.msra.mxu1 %v797_v60  ;;  %v759_v45 = vpack.c.bf16 %v1059_v10, %v1057_v9  ;;  %v1315_v9 = vpack.c.bf16 %v1063_v12, %v1061_v11 }
  0x4c   :  { %742 = vmatpush1.bf16.msra.mxu0 %v741_v42  ;;  %v1071_v16 = vld [vmem:[#allocation5 + $0x150] sm:$0xff]  ;;  %v390_v17 = vld [vmem:[#allocation5 + $0x288] sm:$0xff]  ;;  %v1075_v19 = vld [vmem:[#allocation5 + $0x178] sm:$0xff]  ;;  %800 = vmatprep.subr.bf16.mxu1 %v799_v6 }
  0x4d   :  { %744 = vmatprep.subr.bf16.mxu0 %v743_v47  ;;  %v1073_v18 = vld [vmem:[#allocation5 + $0x168] sm:$0xff]  ;;  %v1077_v20 = vld [vmem:[#allocation5 + $0x160] sm:$0xff]  ;;  %v1079_v21 = vld [vmem:[#allocation5 + $0x170] sm:$0xff] }
  0x4e   :  { %v392_v22 = vld [vmem:[#allocation5 + $0x298] sm:$0xff]  ;;  %v1083_v25 = vld [vmem:[#allocation5 + $0x188] sm:$0xff]  ;;  %v1087_v27 = vld [vmem:[#allocation5 + $0x180] sm:$0xff] }
  0x4f   :  { %v1085_v26 = vld [vmem:[#allocation5 + $0x198] sm:$0xff]  ;;  %v1089_v28 = vld [vmem:[#allocation5 + $0x190] sm:$0xff]  ;;  %v389_v29 = vld [vmem:[#allocation5 + $0x280] sm:$0xff]  ;;  %v803_v32 = vpack.c.bf16 %v392_v22, %v390_v17  ;;  %802 = vmatpush1.bf16.msra.mxu1 %v801_v24 }
  0x50   :  { %746 = vmatpush1.bf16.msra.mxu0 %v745_v57  ;;  %v391_v30 = vld [vmem:[#allocation5 + $0x290] sm:$0xff]  ;;  %v1093_v33 = vld [vmem:[#allocation5 + $0x1a8] sm:$0xff]  ;;  %v1095_v34 = vld [vmem:[#allocation5 + $0x1b8] sm:$0xff] }
  0x51   :  { %748 = vmatprep.subr.bf16.mxu0 %v747_v63  ;;  %v1097_v35 = vld [vmem:[#allocation5 + $0x1a0] sm:$0xff]  ;;  %v1099_v36 = vld [vmem:[#allocation5 + $0x1b0] sm:$0xff]  ;;  %v394_v37 = vld [vmem:[#allocation5 + $0x2a8] sm:$0xff]  ;;  %v805_v54 = vpack.c.bf16 %v391_v30, %v389_v29  ;;  %804 = vmatprep.subr.bf16.mxu1 %v803_v32 }
  0x52   :  { %v396_v38 = vld [vmem:[#allocation5 + $0x2b8] sm:$0xff]  ;;  %v1107_v42 = vld [vmem:[#allocation5 + $0x2a0] sm:$0xff]  ;;  %v1109_v43 = vld [vmem:[#allocation5 + $0x2b0] sm:$0xff] }
  0x53   :  { %v1111_v44 = vld [vmem:[#allocation5 + $0x1c8] sm:$0xff]  ;;  %v1121_v49 = vld [vmem:[#allocation5 + $0x1d8] sm:$0xff]  ;;  %v1123_v50 = vld [vmem:[#allocation5 + $0x1c0] sm:$0xff]  ;;  %v807_v60 = vpack.c.bf16 %v396_v38, %v394_v37  ;;  %v809_v2 = vpack.c.bf16 %v1109_v43, %v1107_v42  ;;  %806 = vmatpush1.bf16.msra.mxu1 %v805_v54 }
  0x54   :  { %v1125_v51 = vld [vmem:[#allocation5 + $0x1d0] sm:$0xff]  ;;  %750 = vmatpush1.bf16.msra.mxu0 %v749_v23  ;;  %v398_v55 = vld [vmem:[#allocation5 + $0x2c8] sm:$0xff]  ;;  %v400_v56 = vld [vmem:[#allocation5 + $0x2d8] sm:$0xff] }
  0x55   :  { %v1131_v57 = vld [vmem:[#allocation5 + $0x2c0] sm:$0xff]  ;;  %752 = vmatprep.subr.bf16.mxu0 %v751_v31  ;;  %v1137_v61 = vld [vmem:[#allocation5 + $0x2d0] sm:$0xff]  ;;  %v1139_v62 = vld [vmem:[#allocation5 + $0x1e8] sm:$0xff]  ;;  %v811_v22 = vpack.c.bf16 %v400_v56, %v398_v55  ;;  %808 = vmatprep.subr.bf16.mxu1 %v807_v60 }
  0x56   :  { %v1141_v63 = vld [vmem:[#allocation5 + $0x1f8] sm:$0xff]  ;;  %v1151_v6 = vld [vmem:[#allocation5 + $0x1e0] sm:$0xff]  ;;  %v1153_v7 = vld [vmem:[#allocation5 + $0x1f0] sm:$0xff]  ;;  %v813_v23 = vpack.c.bf16 %v1137_v61, %v1131_v57 }
  0x57   :  { %v1155_v8 = vld [vmem:[#allocation5 + $0x2e8] sm:$0xff]  ;;  %v404_v29 = vld [vmem:[#allocation5 + $0x2f8] sm:$0xff]  ;;  %v1163_v30 = vld [vmem:[#allocation5 + $0x2e0] sm:$0xff]  ;;  %810 = vmatpush1.bf16.msra.mxu1 %v809_v2 }
  0x58   :  { %v1165_v31 = vld [vmem:[#allocation5 + $0x2f0] sm:$0xff]  ;;  %754 = vmatpush1.bf16.msra.mxu0 %v753_v39  ;;  %v815_v37 = vpack.c.bf16 %v404_v29, %v1155_v8  ;;  %v1172_v42 = vld [vmem:[#allocation2 + $0x4] sm:$0xff]   ;;  %v1176_v55 = vld [vmem:[#allocation2 + $0x1c] sm:$0xff]   ;;  %812 = vmatprep.subr.bf16.mxu1 %v811_v22 }
  0x59   :  { %1311 = vst [vmem:[#allocation12_spill] sm:$0xff] %v1172_v42  ;;  %v1174_v43 = vld [vmem:[#allocation2 + $0x10] sm:$0xff]   ;;  %756 = vmatprep.subr.bf16.mxu0 %v755_v40  ;;  %v1178_v56 = vld [vmem:[#allocation2 + $0x28] sm:$0xff]   ;;  %v1182_v54 = vld [vmem:[#allocation2 + $0x40] sm:$0xff]   ;;  %v134_v57 = vunpack.c.l.bf16 %v1172_v42  ;;  %v136_v8 = vunpack.c.l.bf16 %v1176_v55 }
  0x5a   :  { %1312 = vst [vmem:[#allocation13_spill] sm:$0xff] %v1174_v43  ;;  %v1180_v39 = vld [vmem:[#allocation2 + $0x34] sm:$0xff]   ;;  %v135_v61 = vunpack.c.l.bf16 %v1174_v43  ;;  %v1188_v32 = vld [vmem:[#allocation2 + $0x4c] sm:$0xff]   ;;  %v137_v40 = vunpack.c.l.bf16 %v1178_v56  ;;  %v139_v17 = vunpack.c.l.bf16 %v1182_v54 }
  0x5b   :  { %1313 = vst [vmem:[#allocation14_spill] sm:$0xff] %v1188_v32  ;;  %v1190_v24 = vld [vmem:[#allocation2 + $0x58] sm:$0xff]   ;;  %v138_v60 = vunpack.c.l.bf16 %v1180_v39  ;;  %v140_v1 = vunpack.c.l.bf16 %v1188_v32  ;;  %v142_v59 = vrot.slane %v134_v57, 4  ;;  %v154_v29 = vrot.slane %v136_v8, 4  ;;  %814 = vmatpush1.bf16.msra.mxu1 %v813_v23 }
  0x5c   :  { %1314 = vst [vmem:[#allocation15_spill] sm:$0xff] %v1190_v24  ;;  %v141_v0 = vunpack.c.l.bf16 %v1190_v24  ;;  %v148_v58 = vrot.slane %v135_v61, 4  ;;  %758 = vmatpush1.bf16.msra.mxu0 %v757_v41  ;;  %v160_v53 = vrot.slane %v137_v40, 4  ;;  %v172_v38 = vrot.slane %v139_v17, 4  ;;  %816 = vmatprep.subr.bf16.mxu1 %v815_v37 }
  0x5d   :  { %v166_v52 = vrot.slane %v138_v60, 4  ;;  %760 = vmatprep.subr.bf16.mxu0 %v759_v45  ;;  %v143_v3 = vadd.f32 %v142_v59, %v134_v57  ;;  %v178_v47 = vrot.slane %v140_v1, 4  ;;  %v155_v43 = vadd.f32 %v154_v29, %v136_v8 }
  0x5e   :  { %v149_v48 = vadd.f32 %v148_v58, %v135_v61  ;;  %v184_v46 = vrot.slane %v141_v0, 4  ;;  %v161_v42 = vadd.f32 %v160_v53, %v137_v40  ;;  %v173_v5 = vadd.f32 %v172_v38, %v139_v17  ;;  %v64_v40 = vld [vmem:[#allocation2 + $0x18] ss:$12 sps:$4 sm:$0xff]  }
  0x5f   :  { %v167_v4 = vadd.f32 %v166_v52, %v138_v60  ;;  %v144_v41 = vrot.slane %v143_v3, 2  ;;  %v179_v24 = vadd.f32 %v178_v47, %v140_v1  ;;  %v156_v10 = vrot.slane %v155_v43, 2 }
  0x60   :  { %v150_v2 = vrot.slane %v149_v48, 2  ;;  %v185_v32 = vadd.f32 %v184_v46, %v141_v0  ;;  %762 = vmatpush1.bf16.msra.mxu0 %v1315_v9  ;;  %v162_v45 = vrot.slane %v161_v42, 2  ;;  %v174_v59 = vrot.slane %v173_v5, 2 }
  0x61   :  { %v168_v58 = vrot.slane %v167_v4, 2  ;;  %v1316_v52 = vpack.c.bf16 %v1067_v14, %v1065_v13  ;;  %v145_v53 = vadd.f32 %v144_v41, %v143_v3  ;;  %v180_v47 = vrot.slane %v179_v24, 2 }
  0x62   :  { %v151_v17 = vadd.f32 %v150_v2, %v149_v48  ;;  %v186_v46 = vrot.slane %v185_v32, 2  ;;  %v157_v0 = vadd.f32 %v156_v10, %v155_v43  ;;  %v163_v1 = vadd.f32 %v162_v45, %v161_v42  ;;  %v62_v42 = vld [vmem:[#allocation2] ss:$12 sps:$4 sm:$0xff]  }
  0x63   :  { %764 = vmatprep.subr.bf16.mxu0 %v1316_v52  ;;  %v169_v11 = vadd.f32 %v168_v58, %v167_v4  ;;  %v175_v12 = vadd.f32 %v174_v59, %v173_v5  ;;  %v146_v22 = vrot.slane %v145_v53, 1  ;;  %v181_v38 = vadd.f32 %v180_v47, %v179_v24 }
  0x64   :  { %v152_v23 = vrot.slane %v151_v17, 1  ;;  %v187_v57 = vadd.f32 %v186_v46, %v185_v32  ;;  %v1317_v61 = vpack.c.bf16 %v1071_v16, %v1069_v15  ;;  %v1318_v13 = vpack.c.bf16 %v1165_v31, %v1163_v30  ;;  %v66_v30 = vld [vmem:[#allocation2 + $0x30] ss:$12 sps:$4 sm:$0xff]   ;;  %v68_v31 = vld [vmem:[#allocation2 + $0x48] ss:$12 sps:$4 sm:$0xff]  }
  0x65   :  { %v158_v14 = vrot.slane %v157_v0, 1  ;;  %v164_v48 = vrot.slane %v163_v1, 1  ;;  %v170_v3 = vrot.slane %v169_v11, 1  ;;  %v176_v37 = vrot.slane %v175_v12, 1 }
  0x66   :  { %766 = vmatpush1.bf16.msra.mxu0 %v1317_v61  ;;  %818 = vmatpush1.bf16.msra.mxu1 %v1318_v13  ;;  %v1319_v43 = vpack.c.bf16 %v1075_v19, %v1073_v18  ;;  %v147_v8 = vadd.f32 %v146_v22, %v145_v53  ;;  %v153_v24 = vadd.f32 %v152_v23, %v151_v17  ;;  %v182_v32 = vrot.slane %v181_v38, 1 }
  0x67   :  { %v188_v29 = vrot.slane %v187_v57, 1  ;;  %v159_v15 = vadd.f32 %v158_v14, %v157_v0  ;;  %v165_v16 = vadd.f32 %v164_v48, %v163_v1  ;;  %v171_v60 = vadd.f32 %v170_v3, %v169_v11 }
  0x68   :  { %768 = vmatprep.subr.bf16.mxu0 %v1319_v43  ;;  %v177_v4 = vadd.f32 %v176_v37, %v175_v12  ;;  %v183_v5 = vadd.f32 %v182_v32, %v181_v38  ;;  %v285_v2 = vsel %vm262_vm0, %v153_v24, %v147_v8  ;;  %v70_v9 = vunpack.c.l.bf16 %v62_v42 }
  0x69   :  { %v189_v41 = vadd.f32 %v188_v29, %v187_v57  ;;  %v1320_v18 = vpack.c.bf16 %v1079_v21, %v1077_v20  ;;  %v286_v19 = vsel %vm264_vm1, %v159_v15, %v285_v2  ;;  %v71_v10 = vunpack.c.h.bf16 %v62_v42 }
  0x6a   :  { %v72_v45 = vunpack.c.l.bf16 %v64_v40  ;;  %v73_v58 = vunpack.c.h.bf16 %v64_v40  ;;  %v1321_v59 = vpack.c.bf16 %v1085_v26, %v1083_v25  ;;  %v287_v52 = vsel %vm266_vm2, %v165_v16, %v286_v19 }
  0x6b   :  { %770 = vmatpush1.bf16.msra.mxu0 %v1320_v18  ;;  %v74_v53 = vunpack.c.l.bf16 %v66_v30  ;;  %v75_v17 = vunpack.c.h.bf16 %v66_v30  ;;  %v76_v47 = vunpack.c.l.bf16 %v68_v31  ;;  %v288_v46 = vsel %vm268_vm3, %v171_v60, %v287_v52 }
  0x6c   :  { %772 = vmatprep.subr.bf16.mxu0 %v1321_v59  ;;  %v77_v0 = vunpack.c.h.bf16 %v68_v31  ;;  %v78_v1 = vrot.slane %v70_v9, 4  ;;  %v84_v20 = vrot.slane %v71_v10, 4  ;;  %v289_v21 = vsel %vm270_vm4, %v177_v4, %v288_v46 }
  0x6d   :  { %v90_v11 = vrot.slane %v72_v45, 4  ;;  %v96_v12 = vrot.slane %v73_v58, 4  ;;  %v102_v22 = vrot.slane %v74_v53, 4  ;;  %v1322_v23 = vpack.c.bf16 %v1089_v28, %v1087_v27 }
  0x6e   :  { %v290_v25 = vsel %vm272_vm5, %v183_v5, %v289_v21  ;;  %v79_v26 = vadd.f32 %v78_v1, %v70_v9  ;;  %v85_v38 = vadd.f32 %v84_v20, %v71_v10  ;;  %v108_v57 = vrot.slane %v75_v17, 4 }
  0x6f   :  { %774 = vmatpush1.bf16.msra.mxu0 %v1322_v23  ;;  %v1323_v61 = vpack.c.bf16 %v1095_v34, %v1093_v33  ;;  %v291_v13 = vsel %vm274_vm6, %v189_v41, %v290_v25  ;;  %v91_v14 = vadd.f32 %v90_v11, %v72_v45  ;;  %v97_v48 = vadd.f32 %v96_v12, %v73_v58  ;;  %v1329_v23 = vld [vmem:[#allocation14_spill] sm:$0xff] }
  0x70   :  { %v103_v3 = vadd.f32 %v102_v22, %v74_v53  ;;  %481 = vmatprep.mubr.f32.mxu0 %v291_v13  ;;  %v80_v37 = vrot.slane %v79_v26, 2  ;;  %v86_v42 = vrot.slane %v85_v38, 2  ;;  %v109_v43 = vadd.f32 %v108_v57, %v75_v17 }
  0x71   :  { %776 = vmatprep.subr.bf16.mxu0 %v1323_v61  ;;  %v114_v27 = vrot.slane %v76_v47, 4  ;;  %v92_v28 = vrot.slane %v91_v14, 2  ;;  %v98_v8 = vrot.slane %v97_v48, 2  ;;  %v120_v32 = vrot.slane %v77_v0, 4  ;;  %v1331_v61 = vld [vmem:[#allocation12_spill] sm:$0xff] }
  0x72   :  { %v104_v24 = vrot.slane %v103_v3, 2  ;;  %v1324_v29 = vpack.c.bf16 %v1099_v36, %v1097_v35  ;;  %v81_v33 = vadd.f32 %v80_v37, %v79_v26  ;;  %v87_v34 = vadd.f32 %v86_v42, %v85_v38  ;;  %v1330_v38 = vld [vmem:[#allocation15_spill] sm:$0xff] }
  0x73   :  { %v110_v40 = vrot.slane %v109_v43, 2  ;;  %v115_v15 = vadd.f32 %v114_v27, %v76_v47  ;;  %v1325_v16 = vpack.c.bf16 %v1121_v49, %v1111_v44  ;;  %v93_v60 = vadd.f32 %v92_v28, %v91_v14  ;;  %v1333_v14 = vld [vmem:[#allocation13_spill] sm:$0xff] }
  0x74   :  { %778 = vmatpush1.bf16.msra.mxu0 %v1324_v29  ;;  %v99_v4 = vadd.f32 %v98_v8, %v97_v48  ;;  %v105_v30 = vadd.f32 %v104_v24, %v103_v3  ;;  %v121_v31 = vadd.f32 %v120_v32, %v77_v0  ;;  %v82_v5 = vrot.slane %v81_v33, 1 }
  0x75   :  { %780 = vmatprep.subr.bf16.mxu0 %v1325_v16  ;;  %v88_v41 = vrot.slane %v87_v34, 1  ;;  %v111_v2 = vadd.f32 %v110_v40, %v109_v43  ;;  %v116_v9 = vrot.slane %v115_v15, 2  ;;  %v94_v18 = vrot.slane %v93_v60, 1 }
  0x76   :  { %v100_v19 = vrot.slane %v99_v4, 1  ;;  %v106_v35 = vrot.slane %v105_v30, 1  ;;  %v122_v36 = vrot.slane %v121_v31, 2  ;;  %v1326_v10 = vpack.c.bf16 %v1125_v51, %v1123_v50 }
  0x77   :  { %v83_v45 = vadd.f32 %v82_v5, %v81_v33  ;;  %v89_v58 = vadd.f32 %v88_v41, %v87_v34  ;;  %v112_v44 = vrot.slane %v111_v2, 1  ;;  %v117_v49 = vadd.f32 %v116_v9, %v115_v15 }
  0x78   :  { %782 = vmatpush1.bf16.msra.mxu0 %v1326_v10  ;;  %v1327_v59 = vpack.c.bf16 %v1141_v63, %v1139_v62  ;;  %v95_v52 = vadd.f32 %v94_v18, %v93_v60  ;;  %v101_v53 = vadd.f32 %v100_v19, %v99_v4  ;;  %v107_v17 = vadd.f32 %v106_v35, %v105_v30 }
  0x79   :  { %v123_v47 = vadd.f32 %v122_v36, %v121_v31  ;;  %v113_v46 = vadd.f32 %v112_v44, %v111_v2  ;;  %v118_v0 = vrot.slane %v117_v49, 1  ;;  %v263_v1 = vsel %vm262_vm0, %v89_v58, %v83_v45 }
  0x7a   :  { %784 = vmatprep.subr.bf16.mxu0 %v1327_v59  ;;  %v200_v20 = vunpack.c.h.bf16 %v1176_v55  ;;  %v265_v51 = vsel %vm264_vm1, %v95_v52, %v263_v1  ;;  %v201_v21 = vunpack.c.h.bf16 %v1178_v56  ;;  %v202_v11 = vunpack.c.h.bf16 %v1180_v39 }
  0x7b   :  { %v124_v50 = vrot.slane %v123_v47, 1  ;;  %v1328_v62 = vpack.c.bf16 %v1153_v7, %v1151_v6  ;;  %v119_v63 = vadd.f32 %v118_v0, %v117_v49  ;;  %v267_v12 = vsel %vm266_vm2, %v101_v53, %v265_v51  ;;  %v577_v53 = vld [vmem:[#allocation7 + $0x80] sm:$0xff] }
  0x7c   :  { %v203_v22 = vunpack.c.h.bf16 %v1182_v54  ;;  %v204_v25 = vunpack.c.h.bf16 %v1329_v23  ;;  %v269_v55 = vsel %vm268_vm3, %v107_v17, %v267_v12  ;;  %v205_v57 = vunpack.c.h.bf16 %v1330_v38  ;;  %v578_v17 = vld [vmem:[#allocation7 + $0x88] sm:$0xff] }
  0x7d   :  { %786 = vmatpush1.bf16.msra.mxu0 %v1328_v62  ;;  %v125_v26 = vadd.f32 %v124_v50, %v123_v47  ;;  %v1332_v56 = vunpack.c.h.bf16 %v1331_v61  ;;  %v271_v39 = vsel %vm270_vm4, %v113_v46, %v269_v55  ;;  %v1334_v6 = vunpack.c.h.bf16 %v1333_v14  ;;  %v561_v55 = vld [vmem:[#allocation7] sm:$0xff]  ;;  %v562_v38 = vld [vmem:[#allocation7 + $0x8] sm:$0xff] }
  0x7e   :  { %v218_v48 = vrot.slane %v200_v20, 4  ;;  %v224_v3 = vrot.slane %v201_v21, 4  ;;  %v273_v37 = vsel %vm272_vm5, %v119_v63, %v271_v39  ;;  %v230_v43 = vrot.slane %v202_v11, 4 }
  0x7f   :  { %v206_v13 = vrot.slane %v1332_v56, 4  ;;  %v212_v7 = vrot.slane %v1334_v6, 4  ;;  %v1335_v54 = vmov %v1332_v56  ;;  %v236_v27 = vrot.slane %v203_v22, 4  ;;  %v579_v56 = vld [vmem:[#allocation7 + $0x90] sm:$0xff] }
  0x80   :  { %v275_v28 = vsel %vm274_vm6, %v125_v26, %v273_v37  ;;  %v1336_v8 = vmov %v1334_v6  ;;  %v219_v32 = vadd.f32 %v218_v48, %v200_v20  ;;  %v225_v29 = vadd.f32 %v224_v3, %v201_v21  ;;  %v563_v3 = vld [vmem:[#allocation7 + $0x10] sm:$0xff]  ;;  %v564_v37 = vld [vmem:[#allocation7 + $0x18] sm:$0xff] }
  0x81   :  { %v207_v42 = vadd.f32 %v206_v13, %v1335_v54  ;;  %v213_v24 = vadd.f32 %v212_v7, %v1336_v8  ;;  %482 = vmatmul.mubr.f32.vlgmr.msra.gmra.mrb[0].mxu0 %v275_v28  ;;  %v231_v34 = vadd.f32 %v230_v43, %v202_v11  ;;  %v237_v40 = vadd.f32 %v236_v27, %v203_v22  ;;  %v580_v13 = vld [vmem:[#allocation7 + $0x98] sm:$0xff]  ;;  %v582_v43 = vld [vmem:[#allocation7 + $0xa8] sm:$0xff]  ;;  %v565_v8 = vld [vmem:[#allocation7 + $0x20] sm:$0xff] }
  0x82   :  { %v242_v15 = vrot.slane %v204_v25, 4  ;;  %v220_v60 = vrot.slane %v219_v32, 2  ;;  %v226_v4 = vrot.slane %v225_v29, 2  ;;  %v248_v30 = vrot.slane %v205_v57, 4 }
  0x83   :  { %v208_v33 = vrot.slane %v207_v42, 2  ;;  %v214_v16 = vrot.slane %v213_v24, 2  ;;  %v232_v5 = vrot.slane %v231_v34, 2  ;;  %v238_v41 = vrot.slane %v237_v40, 2 }
  0x84   :  { %v243_v2 = vadd.f32 %v242_v15, %v204_v25  ;;  %v221_v18 = vadd.f32 %v220_v60, %v219_v32  ;;  %v227_v19 = vadd.f32 %v226_v4, %v225_v29  ;;  %v249_v35 = vadd.f32 %v248_v30, %v205_v57  ;;  %v583_v32 = vld [vmem:[#allocation7 + $0xb0] sm:$0xff]  ;;  %v584_v29 = vld [vmem:[#allocation7 + $0xb8] sm:$0xff]  ;;  %v586_v60 = vld [vmem:[#allocation7 + $0xc8] sm:$0xff] }
  0x85   :  { %v209_v31 = vadd.f32 %v208_v33, %v207_v42  ;;  %v215_v9 = vadd.f32 %v214_v16, %v213_v24  ;;  %v233_v10 = vadd.f32 %v232_v5, %v231_v34  ;;  %v239_v45 = vadd.f32 %v238_v41, %v237_v40  ;;  %v581_v42 = vld [vmem:[#allocation7 + $0xa0] sm:$0xff]  ;;  %v566_v24 = vld [vmem:[#allocation7 + $0x28] sm:$0xff]  ;;  %v567_v40 = vld [vmem:[#allocation7 + $0x30] sm:$0xff] }
  0x86   :  { %v244_v58 = vrot.slane %v243_v2, 2  ;;  %v222_v49 = vrot.slane %v221_v18, 1  ;;  %v228_v59 = vrot.slane %v227_v19, 1  ;;  %v250_v52 = vrot.slane %v249_v35, 2  ;;  %v568_v15 = vld [vmem:[#allocation7 + $0x38] sm:$0xff]  ;;  %v585_v16 = vld [vmem:[#allocation7 + $0xc0] sm:$0xff] }
  0x87   :  { %v210_v36 = vrot.slane %v209_v31, 1  ;;  %v216_v44 = vrot.slane %v215_v9, 1  ;;  %v234_v46 = vrot.slane %v233_v10, 1  ;;  %v240_v0 = vrot.slane %v239_v45, 1  ;;  %v570_v5 = vld [vmem:[#allocation7 + $0x48] sm:$0xff]  ;;  %v587_v41 = vld [vmem:[#allocation7 + $0xd0] sm:$0xff] }
  0x88   :  { %v245_v1 = vadd.f32 %v244_v58, %v243_v2  ;;  %v223_v50 = vadd.f32 %v222_v49, %v221_v18  ;;  %v229_v51 = vadd.f32 %v228_v59, %v227_v19  ;;  %v251_v21 = vadd.f32 %v250_v52, %v249_v35  ;;  %v588_v2 = vld [vmem:[#allocation7 + $0xd8] sm:$0xff]  ;;  %v571_v19 = vld [vmem:[#allocation7 + $0x50] sm:$0xff]  ;;  %v574_v49 = vld [vmem:[#allocation7 + $0x68] sm:$0xff] }
  0x89   :  { %v211_v47 = vadd.f32 %v210_v36, %v209_v31  ;;  %v217_v20 = vadd.f32 %v216_v44, %v215_v9  ;;  %v235_v11 = vadd.f32 %v234_v46, %v233_v10  ;;  %v819_v63 = vpack.c.bf16 %v578_v17, %v577_v53  ;;  %v569_v31 = vld [vmem:[#allocation7 + $0x40] sm:$0xff]  ;;  %v572_v35 = vld [vmem:[#allocation7 + $0x58] sm:$0xff]  ;;  %v591_v52 = vld [vmem:[#allocation7 + $0xf0] sm:$0xff] }
  0x8a   :  { %v246_v62 = vrot.slane %v245_v1, 1  ;;  %v241_v12 = vadd.f32 %v240_v0, %v239_v45  ;;  %v252_v22 = vrot.slane %v251_v21, 1  ;;  %v821_v6 = vpack.c.bf16 %v562_v38, %v561_v55  ;;  %v589_v10 = vld [vmem:[#allocation7 + $0xe0] sm:$0xff]  ;;  %v590_v45 = vld [vmem:[#allocation7 + $0xe8] sm:$0xff]  ;;  %v592_v53 = vld [vmem:[#allocation7 + $0xf8] sm:$0xff] }
  0x8b   :  { %v301_v23 = vsel %vm262_vm0, %v217_v20, %v211_v47  ;;  %820 = vmatprep.subr.bf16.mxu1 %v819_v63  ;;  %v823_v48 = vpack.c.bf16 %v580_v13, %v579_v56  ;;  %v825_v27 = vpack.c.bf16 %v564_v37, %v563_v3  ;;  %v827_v28 = vpack.c.bf16 %v582_v43, %v581_v42  ;;  %v573_v44 = vld [vmem:[#allocation7 + $0x60] sm:$0xff]  ;;  %v575_v47 = vld [vmem:[#allocation7 + $0x70] sm:$0xff]  ;;  %v576_v46 = vld [vmem:[#allocation7 + $0x78] sm:$0xff] }
  0x8c   :  { %v247_v25 = vadd.f32 %v246_v62, %v245_v1  ;;  %v302_v26 = vsel %vm264_vm1, %v223_v50, %v301_v23  ;;  %v253_v57 = vadd.f32 %v252_v22, %v251_v21  ;;  %v829_v33 = vpack.c.bf16 %v566_v24, %v565_v8  ;;  %v687_v13 = vld [vmem:[%s1303_s4] ss:$0 sm:$0xff] }
  0x8d   :  { %v303_v61 = vsel %vm266_vm2, %v229_v51, %v302_v26  ;;  %v831_v34 = vpack.c.bf16 %v584_v29, %v583_v32  ;;  %v833_v4 = vpack.c.bf16 %v568_v15, %v567_v40  ;;  %v835_v30 = vpack.c.bf16 %v586_v60, %v585_v16 }
  0x8e   :  { %v304_v39 = vsel %vm268_vm3, %v235_v11, %v303_v61  ;;  %v837_v9 = vpack.c.bf16 %v570_v5, %v569_v31  ;;  %v839_v18 = vpack.c.bf16 %v588_v2, %v587_v41  ;;  %v841_v36 = vpack.c.bf16 %v572_v35, %v571_v19  ;;  %v405_v11 = vld [vmem:[%s1301_s2] sm:$0x3]  ;;  %s970_s2 = smov [#allocation8]  }
  0x8f   :  { %v305_v14 = vsel %vm270_vm4, %v241_v12, %v304_v39  ;;  %v843_v58 = vpack.c.bf16 %v590_v45, %v589_v10  ;;  %v845_v59 = vpack.c.bf16 %v574_v49, %v573_v44  ;;  %v847_v17 = vpack.c.bf16 %v592_v53, %v591_v52  ;;  %s677_s11 = sshll.u32 %s970_s2, 4  ;;  %s678_s11 = int_to_ptr.vmem [resolvable:$true] %s677_s11 }
  0x90   :  { %v306_v7 = vsel %vm272_vm5, %v247_v25, %v305_v14  ;;  %v849_v0 = vpack.c.bf16 %v576_v46, %v575_v47  ;;  %v407_v1 = vlaneseq  ;;  %s932_s12 = scalar_lea.vmem %s678_s11, 128  ;;  %p937_p11 = scmp.lt.s32.totalorder %s678_s11, %s678_s11 }
  0x91   :  { %v307_v54 = vsel %vm274_vm6, %v253_v57, %v306_v7  ;;  %p933_p10 = scmp.ne.s32.totalorder %s678_s11, %s932_s12  ;;  %p938_p12 = scmp.lt.s32.totalorder %s932_s12, %s932_s12 }
  0x92   :  { %553 = vmatmul.mubr.f32.vlgmr.msra.gmra.mrb[0].mxu1 %v307_v54  ;;  %v408_v50 = vshrl.u32 %v407_v1, 7 }
  0x93   :  { %822 = vmatpush3.bf16.msra.mxu1 %v821_v6  ;;  %p939_p13 = por %p938_p12, %p937_p11 }
  0x94   :  { %824 = vmatprep.subr.bf16.mxu1 %v823_v48  ;;  %v409_v21 = vsub.s32 0, %v408_v50  ;;  %v413_v62 = vsub.s32 1, %v408_v50 }
  0x95   :  { %p940_p0 = pnand %p939_p13, %p933_p10 }
  0x96   :  { %v410_v63 = vrot.slane %v405_v11, %v409_v21  ;;  %v414_v12 = vrot.slane %v405_v11, %v413_v62 }
  0x97   :  { %826 = vmatpush3.bf16.msra.mxu1 %v825_v27 }
  0x98   :  { %828 = vmatprep.subr.bf16.mxu1 %v827_v28 }
  0x9b   :  { %830 = vmatpush3.bf16.msra.mxu1 %v829_v33 }
  0x9c   :  { %832 = vmatprep.subr.bf16.mxu1 %v831_v34 }
  0x9f   :  { %834 = vmatpush3.bf16.msra.mxu1 %v833_v4 }
  0xa0   :  { %836 = vmatprep.subr.bf16.mxu1 %v835_v30 }
  0xa3   :  { %838 = vmatpush3.bf16.msra.mxu1 %v837_v9 }
  0xa4   :  { %840 = vmatprep.subr.bf16.mxu1 %v839_v18 }
  0xa7   :  { %842 = vmatpush3.bf16.msra.mxu1 %v841_v36 }
  0xa8   :  { %844 = vmatprep.subr.bf16.mxu1 %v843_v58 }
  0xab   :  { %846 = vmatpush3.bf16.msra.mxu1 %v845_v59 }
  0xac   :  { %848 = vmatprep.subr.bf16.mxu1 %v847_v17 }
  0xaf   :  { %850 = vmatpush3.bf16.msra.mxu1 %v849_v0 }
 0x154   :  { %v483_v20 = vpop.f32.mrb[0].mxu0 }
 0x155   :  { %v485_v51 = vpop.f32.mrb[1].mxu0  ;;  %v484_v22 = vadd.f32 %v483_v20, %v410_v63 }
 0x156   :  { %v486_v23 = vadd.f32 %v485_v51, %v414_v12 }
 0x165   :  { %v554_v25 = vpop.f32.mrb[0].mxu1 }
 0x166   :  { %v555_v26 = vadd.f32 %v554_v25, %v484_v22  ;;  %v556_v55 = vpop.f32.mrb[1].mxu1 }
 0x167   :  { %v557_v38 = vadd.f32 %v556_v55, %v486_v23 }
 0x168   :  { %v559_v61 = vmax.f32 %v555_v26, 0.0 }
 0x169   :  { %v560_v57 = vmax.f32 %v557_v38, 0.0 }
 0x16b   :  { %664 = vmatprep.mubr.f32.mxu1 %v560_v57 }
 0x16c   :  { %665 = vmatmul.mubr.f32.vlgmr.msra.gmra.mrb[2].mxu1 %v559_v61 }
 0x23f   :  { %v720_v56 = vpop.f32.mrb[2].mxu1 }
 0x240   :  { %v721_v39 = vpop.f32.mrb[3].mxu1 }
 0x241   :  { %v722_v14 = vadd.f32 %v721_v39, %v720_v56 }
 0x243   :  { %v667_v6 = vadd.f32 %v722_v14, %v687_v13 }
 0x245   :  { %670 = vst [vmem:[#allocation8] sm:$0xff] %v667_v6 }
 0x246   :  { %943 = shalt.err (!%p940_p0)
}
 0x247   :  { %s944_s15 = scalar_lea.hbm %s1304_s5, 128 }
 0x248   :  { %p945_p1 = scmp.ne.s32.totalorder %s1304_s5, %s944_s15  ;;  %p948_p2 = scmp.lt.u32.totalorder %s944_s15, %s1304_s5 }
 0x24a   :  { %p950_p3 = pnand %p948_p2, %p945_p1 }
 0x24c   :  { %953 = shalt.err (!%p950_p3)
}
 0x24d   :  { %680 = dma.vmem_to_hbm [thread:$0]  %s678_s11, 128, %s1304_s5, [#allocation4]  }
 0x24e   :  { %958 = dma.done.wait [#allocation4], 128  }
 0x24f   :  { %959 = vsyncadd [#allocation4], 4294967168 }
 0x250   :  { %684 = vsyncpa [#allocation3], 1 }
 0x251   :  { %685 = vsyncpa [#allocation6], 1 }
 0x252   :  { %686 = vsyncpa [#allocation4], 1 }

</bundles_post_ra>
